<compile_context>
chip_gen: v5e
topology: v5e:2x2
jax: 0.10.0
libtpu: 0.0.40
codegen_flags: <defaults>
</compile_context>

<pallas_src>
import jax
import jax.numpy as jnp
import numpy as np
from jax.experimental import pallas as pl
from jax.experimental.pallas import tpu as pltpu

DILATIONS = (7, 5, 3, 1)   # dilation of the 3x3 conv in branches 1..4
_LANE_CAP = 2048           # max pixels folded into one grid step's lane axis


def _cdiv(a, b):
    return -(-a // b)


_ROLL_SIGN = None


def _roll_sign():
    """Pin down pltpu.roll's shift convention empirically (tiny probe, cached)."""
    global _ROLL_SIGN
    if _ROLL_SIGN is None:
        def probe(x_ref, o_ref):
            o_ref[...] = pltpu.roll(x_ref[...], shift=1, axis=1)

        x = jax.lax.broadcasted_iota(jnp.float32, (8, 128), 1)
        o = pl.pallas_call(
            probe, out_shape=jax.ShapeDtypeStruct((8, 128), jnp.float32))(x)
        # jnp.roll semantics (out[i] = x[i - shift]) -> o[0, 0] == 127
        _ROLL_SIGN = -1 if float(o[0, 0]) == 127.0 else 1
    return _ROLL_SIGN


def make_tffm_kernel(H, W, in_d, out_d, n_img, roll_sign):
    HW = H * W
    NL = n_img * HW

    def shift_of(offset):
        # Roll that realizes out[p] = y[p + offset] (wrap positions get masked).
        return (roll_sign * offset) % NL

    def kernel(x1_ref, x2_ref, masks_ref, wd123_ref, sh123_ref,
               wd4_ref, sh4_ref, wpt_ref, bp_ref, out_ref, slab_ref):
        f32 = jnp.float32
        bf16 = jnp.bfloat16

        x = jnp.abs(x1_ref[0] - x2_ref[0])                      # (Cin, NL) f32

        def fill_slab(y, branch):
            """9 lane-rolled, border-masked taps -> slab_ref (9*Cin, NL) f32."""
            d = DILATIONS[branch]
            for iy, ky in enumerate((-1, 0, 1)):
                row = y if ky == 0 else pltpu.roll(
                    y, shift=shift_of(ky * d * W), axis=1)
                for ix, kx in enumerate((-1, 0, 1)):
                    k = iy * 3 + ix
                    t = row if kx == 0 else pltpu.roll(
                        row, shift=shift_of(kx * d), axis=1)
                    if ky != 0 or kx != 0:                       # zero borders /
                        t = t * masks_ref[branch * 9 + k]        # wrapped lanes
                    slab_ref[k * in_d:(k + 1) * in_d, :] = t

        def dconv(y, w_t, sh, branch):
            """Dilated 3x3 'same' conv + folded bias/BN: (Cin,NL) -> (Cout,NL)."""
            fill_slab(y, branch)
            return jnp.dot(w_t, slab_ref[...].astype(bf16),
                           preferred_element_type=f32) + sh

        # All four 1x1 convs share |x1-x2|: one fused (3*Cin+Cout, Cin) matmul.
        p_all = jnp.dot(wpt_ref[...], x.astype(bf16),
                        preferred_element_type=f32) + bp_ref[...]

        br = dconv(x, wd123_ref[0], sh123_ref[0], 0)             # branch 1 (d=7)
        for i in (1, 2):                                         # branches 2, 3
            y = jnp.maximum(p_all[(i - 1) * in_d:i * in_d, :] + br, 0.0)
            br = dconv(y, wd123_ref[i], sh123_ref[i], i)
        y = jnp.maximum(p_all[2 * in_d:3 * in_d, :] + br, 0.0)   # branch 4 (d=1)
        br = dconv(y, wd4_ref[...], sh4_ref[...], 3)
        out = jnp.maximum(p_all[3 * in_d:3 * in_d + out_d, :] + br, 0.0)
        out_ref[0] = out.astype(out_ref.dtype)

    return kernel


def _fold_dconv(w, b, bn, eps=1e-5):
    """Fold conv bias + eval-mode BatchNorm into (Cout, 9*Cin) weight and shift."""
    gamma, beta, mean, var = bn
    s = gamma / jnp.sqrt(var + eps)
    cout, cin = w.shape[0], w.shape[1]
    w_t = jnp.transpose(w, (0, 2, 3, 1)).reshape(cout, 9 * cin) * s[:, None]
    shift = (b - mean) * s + beta
    return w_t.astype(jnp.float32), shift[:, None].astype(jnp.float32)


def _build_tap_masks(H, W, n_img):
    """(4*9, 1, n_img*H*W) f32 masks: 1.0 where the rolled read is in-bounds."""
    hh, ww = np.meshgrid(np.arange(H), np.arange(W), indexing="ij")
    hh, ww = hh.reshape(-1), ww.reshape(-1)
    masks = []
    for d in DILATIONS:
        for k in range(9):
            ky, kx = k // 3 - 1, k % 3 - 1
            valid = ((hh + ky * d >= 0) & (hh + ky * d < H) &
                     (ww + kx * d >= 0) & (ww + kx * d < W))
            masks.append(np.tile(valid.astype(np.float32), n_img))
    return jnp.asarray(np.stack(masks, axis=0)[:, None, :])


def pack_params(p):
    w1t, s1 = _fold_dconv(p["w1"], p["b1"], p["bn1"])
    w2t, s2 = _fold_dconv(p["w2f"], p["b2f"], p["bn2"])
    w3t, s3 = _fold_dconv(p["w3f"], p["b3f"], p["bn3"])
    wd4, sh4 = _fold_dconv(p["w4f"], p["b4f"], p["bn4"])
    # Weights pre-cast to bf16 host-side (MXU operand dtype); shifts stay f32.
    wd123 = jnp.stack([w1t, w2t, w3t], axis=0).astype(jnp.bfloat16)
    sh123 = jnp.stack([s1, s2, s3], axis=0)
    wpt = jnp.concatenate([p["w2p"], p["w3p"], p["w4p"], p["w5p"]], axis=0)
    bp = jnp.concatenate([p["b2p"], p["b3p"], p["b4p"], p["b5p"]], axis=0)[:, None]
    return (wd123, sh123, wd4.astype(jnp.bfloat16), sh4,
            wpt.astype(jnp.bfloat16), bp.astype(jnp.float32))


def temporal_feature_fusion(x1, x2, params):
    """x1, x2: (B, Cin, H, W) float32 (NCHW, PyTorch layout)."""
    B, Cin, H, W = x1.shape
    out_d = params["w5p"].shape[0]
    HW = H * W
    assert Cin % 8 == 0, "in_d must be a multiple of 8 (f32 sublane tile)"
    assert HW % 128 == 0, "H*W must be a multiple of 128 (lane tile)"

    # Fold the batch into the lane axis. v5e/v6e (1 TensorCore): one wide step.
    # v7x (2 TensorCores): keep >=2 'parallel' grid steps so both cores work.
    try:
        kind = jax.devices()[0].device_kind.lower()
    except Exception:
        kind = ""
    two_core = ("v7" in kind) or ("7x" in kind)
    bb = min(B, max(1, _LANE_CAP // HW))
    if two_core and B >= 2:
        bb = min(bb, _cdiv(B, 2))
    n_steps = _cdiv(B, bb)
    Bp = n_steps * bb
    NL = bb * HW

    wd123, sh123, wd4, sh4, wpt, bp = pack_params(params)
    masks = _build_tap_masks(H, W, bb)

    def fold(x):
        if Bp != B:
            x = jnp.pad(x, ((0, Bp - B), (0, 0), (0, 0), (0, 0)))
        return (x.reshape(n_steps, bb, Cin, HW)
                 .transpose(0, 2, 1, 3)
                 .reshape(n_steps, Cin, NL))

    args = (fold(x1), fold(x2), masks, wd123, sh123, wd4, sh4, wpt, bp)

    def const_spec(a):
        nd = a.ndim
        return pl.BlockSpec(a.shape, lambda s, _nd=nd: (0,) * _nd)

    in_specs = [pl.BlockSpec((1, Cin, NL), lambda s: (s, 0, 0)),
                pl.BlockSpec((1, Cin, NL), lambda s: (s, 0, 0))]
    in_specs += [const_spec(a) for a in args[2:]]

    # TODO(synk): for large H*W add a halo'd (halo = 7) spatial grid axis; on
    # v7x budget that tile against 64 MiB VMEM (about half the v5e/v6e tile)
    # and set vmem_limit_bytes explicitly.
    out = pl.pallas_call(
        make_tffm_kernel(H, W, Cin, out_d, bb, _roll_sign()),
        out_shape=jax.ShapeDtypeStruct((n_steps, out_d, NL), jnp.float32),
        grid_spec=pltpu.PrefetchScalarGridSpec(
            num_scalar_prefetch=0,
            grid=(n_steps,),
            in_specs=in_specs,
            out_specs=pl.BlockSpec((1, out_d, NL), lambda s: (s, 0, 0)),
            scratch_shapes=[pltpu.VMEM((9 * Cin, NL), jnp.float32)]),
        compiler_params=pltpu.CompilerParams(
            dimension_semantics=("parallel",)),
    )(*args)

    out = (out.reshape(n_steps, out_d, bb, HW)
              .transpose(0, 2, 1, 3)
              .reshape(Bp, out_d, H, W))
    return out[:B]


def init_params(key, in_d, out_d):
    ks = iter(jax.random.split(key, 40))

    def nrm(shape, scale=0.1):
        return (scale * jax.random.normal(next(ks), shape)).astype(jnp.float32)

    def bn(c):
        gamma = (1.0 + 0.1 * jax.random.normal(next(ks), (c,))).astype(jnp.float32)
        beta = (0.1 * jax.random.normal(next(ks), (c,))).astype(jnp.float32)
        mean = (0.1 * jax.random.normal(next(ks), (c,))).astype(jnp.float32)
        var = (jnp.abs(jax.random.normal(next(ks), (c,))) + 0.5).astype(jnp.float32)
        return (gamma, beta, mean, var)

    p = {}
    p["w1"], p["b1"], p["bn1"] = nrm((in_d, in_d, 3, 3)), nrm((in_d,)), bn(in_d)
    p["w2p"], p["b2p"] = nrm((in_d, in_d)), nrm((in_d,))
    p["w2f"], p["b2f"], p["bn2"] = nrm((in_d, in_d, 3, 3)), nrm((in_d,)), bn(in_d)
    p["w3p"], p["b3p"] = nrm((in_d, in_d)), nrm((in_d,))
    p["w3f"], p["b3f"], p["bn3"] = nrm((in_d, in_d, 3, 3)), nrm((in_d,)), bn(in_d)
    p["w4p"], p["b4p"] = nrm((in_d, in_d)), nrm((in_d,))
    p["w4f"], p["b4f"], p["bn4"] = nrm((out_d, in_d, 3, 3)), nrm((out_d,)), bn(out_d)
    p["w5p"], p["b5p"] = nrm((out_d, in_d)), nrm((out_d,))
    return p


def ref_forward(x1, x2, p):
    """Pure-JAX NCHW reference of the PyTorch forward (f32, HIGHEST precision)."""
    hp = jax.lax.Precision.HIGHEST
    x = jnp.abs(x1 - x2)

    def bn(y, gamma, beta, mean, var, eps=1e-5):
        s = (gamma / jnp.sqrt(var + eps))[None, :, None, None]
        return (y - mean[None, :, None, None]) * s + beta[None, :, None, None]

    def dconv(inp, w, b, d):
        y = jax.lax.conv_general_dilated(
            inp, w, window_strides=(1, 1), padding=[(d, d), (d, d)],
            rhs_dilation=(d, d),
            dimension_numbers=("NCHW", "OIHW", "NCHW"), precision=hp)
        return y + b[None, :, None, None]

    def pconv(inp, w, b):
        return (jnp.einsum("bchw,oc->bohw", inp, w, precision=hp)
                + b[None, :, None, None])

    br1 = bn(dconv(x, p["w1"], p["b1"], 7), *p["bn1"])
    y2 = jax.nn.relu(pconv(x, p["w2p"], p["b2p"]) + br1)
    br2 = bn(dconv(y2, p["w2f"], p["b2f"], 5), *p["bn2"])
    y3 = jax.nn.relu(pconv(x, p["w3p"], p["b3p"]) + br2)
    br3 = bn(dconv(y3, p["w3f"], p["b3f"], 3), *p["bn3"])
    y4 = jax.nn.relu(pconv(x, p["w4p"], p["b4p"]) + br3)
    br4 = bn(dconv(y4, p["w4f"], p["b4f"], 1), *p["bn4"])
    return jax.nn.relu(pconv(x, p["w5p"], p["b5p"]) + br4)


if __name__ == "__main__":
    B, in_d, out_d, H, W = 2, 8, 8, 16, 16
    key = jax.random.PRNGKey(0)
    k1, k2, kp = jax.random.split(key, 3)

    x1 = jax.random.normal(k1, (B, in_d, H, W), jnp.float32)  # PyTorch NCHW layout
    x2 = jax.random.normal(k2, (B, in_d, H, W), jnp.float32)
    params = init_params(kp, in_d, out_d)

    out = jax.block_until_ready(temporal_feature_fusion(x1, x2, params))
    assert out.shape == (B, out_d, H, W)

    ref = ref_forward(x1, x2, params)
    max_err = float(jnp.max(jnp.abs(out - ref)))
    # Kernel uses bf16 MXU operands (f32 accumulation + f32 element-wise);
    # reference is full f32 HIGHEST precision.
    if not bool(jnp.allclose(out, ref, atol=5e-2, rtol=5e-2)):
        raise AssertionError(f"kernel/reference mismatch, max abs err = {max_err}")
    print("KERNEL_OK")
</pallas_src>

<mosaic_0001>
module attributes {stable_mosaic.version = 11 : i64} {
  func.func @probe(%arg0: memref<8x128xf32, #tpu.memory_space<vmem>>, %arg1: memref<8x128xf32, #tpu.memory_space<vmem>>) attributes {dimension_semantics = [], scalar_prefetch = 0 : i64, scratch_operands = 0 : i64, tpu.core_type = #tpu.core_type<tc>} {
    %c0 = arith.constant 0 : index
    %c0_0 = arith.constant 0 : index
    %0 = vector.load %arg0[%c0, %c0_0] : memref<8x128xf32, #tpu.memory_space<vmem>>, vector<8x128xf32>
    %c1_i32 = arith.constant 1 : i32
    %1 = tpu.dynamic_rotate %0 by %c1_i32 dim 1 : vector<8x128xf32>, i32 -> vector<8x128xf32>
    %c0_1 = arith.constant 0 : index
    %c0_2 = arith.constant 0 : index
    %2 = vector.load %arg1[%c0_1, %c0_2] : memref<8x128xf32, #tpu.memory_space<vmem>>, vector<8x128xf32>
    tpu.vector_store %arg1[%c0_1, %c0_2], %1 {strides = array<i32>} : memref<8x128xf32, #tpu.memory_space<vmem>>, vector<8x128xf32>,
    return
  }
}

</mosaic_0001>

<bundles_post_ra>
// kernel: tpu_custom_call.1
= control target key start
LH: loop header
LB: loop body
LE: loop exit
PB: predicated region body
PF: predicated region fallthrough
CT: control target
= control target key end

     0   :  { %6 = vsyncpa [#allocation3], 0  ;;  %s118_s0 = inlined_call_operand.hbm [shape: f32[8,128], index: 0, kind: input, shape index: {}]   ;;  %s119_s1 = inlined_call_operand.hbm [shape: f32[8,128], index: 1, kind: output, shape index: {}]  }
   0x1   :  { %7 = vsyncpa [#allocation4], 0  ;;  %s13_s8 = sshll.u32 %s118_s0, 4  ;;  %s99_s9 = smov [#allocation2]   ;;  %s14_s8 = int_to_ptr.hbm [resolvable:$true] %s13_s8 }
   0x2   :  { %s15_s10 = sshll.u32 %s99_s9, 4  ;;  %s16_s10 = int_to_ptr.vmem [resolvable:$true] %s15_s10 }
   0x3   :  { %18 = dma.hbm_to_vmem [thread:$0]  %s14_s8, 128, %s16_s10, [#allocation3]  }
   0x4   :  { %95 = dma.done.wait [#allocation3], 128  }
   0x5   :  { %96 = vsyncadd [#allocation3], 4294967168  ;;  %v23_v0 = vld [vmem:[#allocation2] sm:$0xff]  ;;  %s100_s11 = smov 1   ;;  %s101_s12 = smov [#allocation5]  }
   0x6   :  { %24 = vrot.lane.b32.xlu0 %v23_v0, %s100_s11  ;;  %s32_s13 = sshll.u32 %s101_s12, 4  ;;  %s34_s16 = sshll.u32 %s119_s1, 4  ;;  %s33_s13 = int_to_ptr.vmem [resolvable:$true] %s32_s13  ;;  %s35_s16 = int_to_ptr.hbm [resolvable:$true] %s34_s16 }
  0x78   :  { %v25_v1 = vpop.permute.xlu0 %24 }
  0x79   :  { %26 = vst [vmem:[#allocation5] sm:$0xff] %v25_v1 }
  0x7a   :  { %37 = dma.vmem_to_hbm [thread:$0]  %s33_s13, 128, %s35_s16, [#allocation4]  }
  0x7b   :  { %97 = dma.done.wait [#allocation4], 128  }
  0x7c   :  { %98 = vsyncadd [#allocation4], 4294967168 }
  0x7d   :  { %42 = vsyncpa [#allocation3], 1 }
  0x7e   :  { %43 = vsyncpa [#allocation4], 1 }

</bundles_post_ra>
